<compile_context>
chip_gen: v7x
topology: tpu7x:2x2x1
jax: 0.10.0
libtpu: 0.0.40
codegen_flags: <defaults>
</compile_context>

<pallas_src>
import functools
import math

import jax
import jax.numpy as jnp
from jax.experimental import pallas as pl
from jax.experimental.pallas import tpu as pltpu

_SHIFT = math.log(2.0)
_THRESHOLD = 20.0  # matches torch.nn.functional.softplus default threshold


def _shifted_softplus_kernel(x_ref, o_ref, *, compute_dtype):
    x = x_ref[...].astype(compute_dtype)
    thr = jnp.asarray(_THRESHOLD, dtype=compute_dtype)
    # Numerically stable softplus with PyTorch's threshold behavior:
    #   x > 20 -> x ; else log1p(exp(x)) (min-clamp keeps untaken branch finite)
    sp = jnp.where(x > thr, x, jnp.log1p(jnp.exp(jnp.minimum(x, thr))))
    o_ref[...] = (sp - jnp.asarray(_SHIFT, dtype=compute_dtype)).astype(o_ref.dtype)


def _xla_fallback(x):
    return jax.nn.softplus(x) - jnp.asarray(_SHIFT, dtype=x.dtype)


def _bf16_native_ok() -> bool:
    """True if the local TPU generation has bf16 VPU/EUP (v6e / v7x and newer)."""
    try:
        d = jax.devices()[0]
        if d.platform != "tpu":
            return False
        kind = d.device_kind.lower()
    except Exception:
        return False
    return any(tag in kind for tag in ("v6", "v7", "trillium", "ironwood"))


def shifted_softplus(
    x: jax.Array,
    *,
    target_block_bytes: int = 2 << 20,
    min_pallas_bytes: int = 1 << 16,
) -> jax.Array:
    """Elementwise ShiftedSoftplus (softplus(x) - log 2) via a Pallas TPU kernel."""
    orig_shape = x.shape
    dtype = x.dtype
    total = x.size
    if total == 0:
        return x
    itemsize = jnp.dtype(dtype).itemsize

    # Tiny tensors: let XLA fuse a plain elementwise op into neighbors;
    # the pallas_call fixed cost would dominate.
    if total * itemsize < min_pallas_bytes:
        return _xla_fallback(x)

    # --- Choose a 2D view WITHOUT copying (no pad, no slice). ---------------
    # Preferred: lane-dense [rows, w] with w a multiple of 128 dividing `total`
    # (free row-major reshape).  Otherwise collapse leading dims and keep the
    # original last dim; Pallas masks ragged edges of boundary blocks.
    w = None
    for cand in (4096, 2048, 1024, 512, 256, 128):
        if total % cand == 0:
            w = cand
            break
    if w is not None:
        rows = total // w
    elif x.ndim >= 2:
        w = orig_shape[-1]
        rows = total // w
    else:
        w = total
        rows = 1
    x2d = x.reshape(rows, w)

    # --- Block sizing. -------------------------------------------------------
    # Sublane multiple depends on dtype packing (f32: 8, bf16: 16, int8/fp8: 32).
    sublane = max(8, 32 // itemsize)
    br = max(1, target_block_bytes // (w * itemsize))
    br = max(sublane, (br // sublane) * sublane)
    if rows <= br:
        if rows >= 2 * sublane:
            # Split into >= 2 blocks so both v7x TensorCores get work on the
            # "parallel" grid axis; neutral on single-TC chips.
            half = (rows + 1) // 2
            br = ((half + sublane - 1) // sublane) * sublane
        else:
            br = rows  # single full-extent block (equal to array dim: allowed)
    block_bytes = br * w * itemsize

    # Very wide, non-128-aligned rows that cannot form a sane block: let XLA
    # handle it instead of blowing VMEM.
    if block_bytes > (6 << 20):
        return _xla_fallback(x)

    grid = pl.cdiv(rows, br)

    # Compute dtype: bf16-native on v6e/v7x (keeps EUP under the HBM time),
    # f32 otherwise (v5e has no bf16 VPU/EUP).
    if dtype == jnp.bfloat16 and _bf16_native_ok():
        compute_dtype = jnp.bfloat16
    else:
        compute_dtype = jnp.float32

    # VMEM budget: double-buffered in+out blocks + f32 temporaries + slack.
    # Kept modest (<= 32 MiB) so it stays comfortable under v7x's 64 MiB VMEM.
    f32_temp = br * w * 4
    vmem_limit = int(min(32 << 20,
                         max(8 << 20, 4 * block_bytes + 2 * f32_temp + (2 << 20))))

    processed = grid * br * w  # elements the grid actually touches (>= total)
    cost = pl.CostEstimate(
        flops=3 * processed,                 # where/min/sub on the VPU
        transcendentals=2 * processed,       # exp + log1p per element
        bytes_accessed=2 * processed * itemsize,
    )

    out2d = pl.pallas_call(
        functools.partial(_shifted_softplus_kernel, compute_dtype=compute_dtype),
        out_shape=jax.ShapeDtypeStruct((rows, w), dtype),
        grid_spec=pltpu.PrefetchScalarGridSpec(
            num_scalar_prefetch=0,
            grid=(grid,),
            in_specs=[pl.BlockSpec((br, w), lambda i: (i, 0))],
            out_specs=pl.BlockSpec((br, w), lambda i: (i, 0)),
        ),
        compiler_params=pltpu.CompilerParams(
            dimension_semantics=("parallel",),
            vmem_limit_bytes=vmem_limit,
        ),
        cost_estimate=cost,
    )(x2d)

    return out2d.reshape(orig_shape)


if __name__ == "__main__":
    key = jax.random.PRNGKey(0)
    k1, k2, k3 = jax.random.split(key, 3)
    shift = math.log(2.0)

    # 1) SchNet-like hidden activation: 16 nodes x 128 features (f32).
    #    Force the Pallas path even though the tensor is small.
    x1 = jax.random.normal(k1, (16, 128), dtype=jnp.float32) * 5.0
    y1 = jax.block_until_ready(shifted_softplus(x1, min_pallas_bytes=0))
    r1 = jax.nn.softplus(x1) - shift
    assert y1.shape == x1.shape and y1.dtype == x1.dtype
    assert jnp.allclose(y1, r1, atol=1e-5, rtol=1e-5), "mismatch vs reference (f32)"

    # 2) Odd, non-128-aligned shape — exercises the direct-2D path
    #    (no pad / no slice, masked stores).
    x2 = jax.random.normal(k2, (13, 37), dtype=jnp.float32) * 5.0
    y2 = jax.block_until_ready(shifted_softplus(x2, min_pallas_bytes=0))
    r2 = jax.nn.softplus(x2) - shift
    assert y2.shape == x2.shape
    assert jnp.allclose(y2, r2, atol=1e-5, rtol=1e-5), "mismatch vs reference (odd shape)"

    # 3) bf16 input — bf16-native compute on v6e/v7x, f32 upcast on v5e.
    x3 = (jax.random.normal(k3, (32, 128), dtype=jnp.float32) * 3.0).astype(jnp.bfloat16)
    y3 = jax.block_until_ready(shifted_softplus(x3, min_pallas_bytes=0))
    r3 = jax.nn.softplus(x3.astype(jnp.float32)) - shift
    assert y3.shape == x3.shape and y3.dtype == jnp.bfloat16
    assert jnp.allclose(y3.astype(jnp.float32), r3, atol=5e-2, rtol=5e-2), \
        "mismatch vs reference (bf16)"

    # 4) Default small-size fallback path (plain jnp, XLA-fused) still matches.
    y4 = jax.block_until_ready(shifted_softplus(x1))
    assert jnp.allclose(y4, r1, atol=1e-5, rtol=1e-5), "mismatch vs reference (fallback)"

    print("KERNEL_OK")
</pallas_src>

<mosaic_0001>
module attributes {stable_mosaic.version = 11 : i64} {
  func.func @_shifted_softplus_kernel(%arg0: i32, %arg1: memref<1x2048xf32, #tpu.memory_space<vmem>>, %arg2: memref<1x2048xf32, #tpu.memory_space<vmem>>) attributes {dimension_semantics = [#tpu.dimension_semantics<parallel>], iteration_bounds = array<i64: 1>, scalar_prefetch = 0 : i64, scratch_operands = 0 : i64, tpu.core_type = #tpu.core_type<tc>, window_params = [{transform_indices = @transform_0, window_bounds = array<i64: 1, 2048>}, {transform_indices = @transform_1, window_bounds = array<i64: 1, 2048>}]} {
    %c0 = arith.constant 0 : index
    %c0_0 = arith.constant 0 : index
    %0 = vector.load %arg1[%c0, %c0_0] : memref<1x2048xf32, #tpu.memory_space<vmem>>, vector<1x2048xf32>
    %cst = arith.constant 2.000000e+01 : f32
    %1 = vector.broadcast %cst : f32 to vector<1x2048xf32>
    %2 = arith.cmpf ogt, %0, %1 : vector<1x2048xf32>
    %cst_1 = arith.constant 2.000000e+01 : f32
    %3 = vector.broadcast %cst_1 : f32 to vector<1x2048xf32>
    %4 = arith.minimumf %0, %3 : vector<1x2048xf32>
    %5 = math.exp %4 : vector<1x2048xf32>
    %6 = math.log1p %5 : vector<1x2048xf32>
    %7 = arith.select %2, %0, %6 : vector<1x2048xi1>, vector<1x2048xf32>
    %cst_2 = arith.constant 0.693147182 : f32
    %8 = vector.broadcast %cst_2 : f32 to vector<1x2048xf32>
    %9 = arith.subf %7, %8 : vector<1x2048xf32>
    %c0_3 = arith.constant 0 : index
    %c0_4 = arith.constant 0 : index
    %10 = vector.load %arg2[%c0_3, %c0_4] : memref<1x2048xf32, #tpu.memory_space<vmem>>, vector<1x2048xf32>
    tpu.vector_store %arg2[%c0_3, %c0_4], %9 {strides = array<i32>} : memref<1x2048xf32, #tpu.memory_space<vmem>>, vector<1x2048xf32>,
    return
  }
  func.func @transform_0(%arg0: i32) -> (i32, i32) {
    %c0_i32 = arith.constant 0 : i32
    %c0_i32_0 = arith.constant 0 : i32
    return %arg0, %c0_i32 : i32, i32
  }
  func.func @transform_1(%arg0: i32) -> (i32, i32) {
    %c0_i32 = arith.constant 0 : i32
    %c0_i32_0 = arith.constant 0 : i32
    return %arg0, %c0_i32 : i32, i32
  }
}

</mosaic_0001>

<bundles_post_ra>
// kernel: tpu_custom_call.1
= control target key start
LH: loop header
LB: loop body
LE: loop exit
PB: predicated region body
PF: predicated region fallthrough
CT: control target
= control target key end

     0   :  { %6 = vsyncpa [#allocation3], 0  ;;  %s166_s0 = inlined_call_operand.hbm [shape: f32[1,2048], index: 0, kind: input, shape index: {}]   ;;  %s167_s1 = inlined_call_operand.hbm [shape: f32[1,2048], index: 1, kind: output, shape index: {}]  }
   0x1   :  { %7 = vsyncpa [#allocation4], 0  ;;  %s130_s6 = smov [#allocation2]   ;;  %s82_s10 = scalar_lea.hbm %s166_s0, 256 }
   0x2   :  { %s14_s7 = sshll.u32 %s130_s6, 4  ;;  %p83_p0 = scmp.ne.s32.totalorder %s166_s0, %s82_s10  ;;  %s15_s7 = int_to_ptr.vmem [resolvable:$true] %s14_s7 }
   0x3   :  { %p86_p1 = scmp.lt.u32.totalorder %s82_s10, %s166_s0 }
   0x5   :  { %p88_p2 = pnand %p86_p1, %p83_p0 }
   0x7   :  { %91 = shalt.err (!%p88_p2)
}
   0x8   :  { %s92_s15 = scalar_lea.vmem %s15_s7, 256  ;;  %p97_p4 = scmp.lt.s32.totalorder %s15_s7, %s15_s7 }
   0x9   :  { %p93_p3 = scmp.ne.s32.totalorder %s15_s7, %s92_s15  ;;  %p98_p5 = scmp.lt.s32.totalorder %s92_s15, %s92_s15 }
   0xb   :  { %p99_p6 = por %p98_p5, %p97_p4 }
   0xd   :  { %p100_p7 = pnand %p99_p6, %p93_p3 }
   0xf   :  { %103 = shalt.err (!%p100_p7)
}
  0x10   :  { %17 = dma.hbm_to_vmem [thread:$0]  %s166_s0, 256, %s15_s7, [#allocation3]  }
  0x11   :  { %126 = dma.done.wait [#allocation3], 256  }
  0x12   :  { %127 = vsyncadd [#allocation3], 4294967040  ;;  %v21_v0 = vld [vmem:[#allocation2] sm:$0xff]  ;;  %v22_v1 = vld [vmem:[#allocation2 + $0x8] sm:$0xff]  ;;  %s131_s0 = smov [#allocation5]  }
  0x13   :  { %v25_v2 = vmin.f32 %v21_v0, 20.0  ;;  %v26_v3 = vmin.f32 %v22_v1, 20.0  ;;  %vm23_vm1 = vcmp.gt.f32.partialorder %v21_v0, 20.0  ;;  %vm24_vm3 = vcmp.gt.f32.partialorder %v22_v1, 20.0  ;;  %s61_s18 = sshll.u32 %s131_s0, 4  ;;  %s62_s18 = int_to_ptr.vmem [resolvable:$true] %s61_s18 }
  0x14   :  { %s104_s19 = scalar_lea.vmem %s62_s18, 256  ;;  %p109_p9 = scmp.lt.s32.totalorder %s62_s18, %s62_s18 }
  0x15   :  { %v27_v4 = vmul.f32 1.442695, %v25_v2  ;;  %v29_v5 = vmul.f32 1.442695, %v26_v3  ;;  %p105_p8 = scmp.ne.s32.totalorder %s62_s18, %s104_s19  ;;  %p110_p10 = scmp.lt.s32.totalorder %s104_s19, %s104_s19 }
  0x17   :  { %74 = vpow2.f32 %v27_v4  ;;  %p111_p11 = por %p110_p10, %p109_p9 }
  0x18   :  { %76 = vpow2.f32 %v29_v5 }
  0x19   :  { %p112_p12 = pnand %p111_p11, %p105_p8 }
  0x21   :  { %v75_v6 = vpop.eup %74 }
  0x22   :  { %v77_v7 = vpop.eup %76  ;;  %v31_v8 = vadd.f32 1.0, %v75_v6  ;;  %v34_v10 = vmul.f32 -0.5, %v75_v6  ;;  %v37_v13 = vand.u32 2147483647, %v75_v6 }
  0x23   :  { %v40_v9 = vadd.f32 1.0, %v77_v7  ;;  %v43_v11 = vmul.f32 -0.5, %v77_v7  ;;  %v46_v15 = vand.u32 2147483647, %v77_v7 }
  0x24   :  { %78 = vlog2.f32 %v31_v8  ;;  %v35_v12 = vadd.f32 1.0, %v34_v10  ;;  %vm38_vm0 = vcmp.lt.f32.partialorder %v37_v13, 0.0004427343 }
  0x25   :  { %80 = vlog2.f32 %v40_v9  ;;  %v44_v14 = vadd.f32 1.0, %v43_v11  ;;  %vm47_vm2 = vcmp.lt.f32.partialorder %v46_v15, 0.0004427343 }
  0x26   :  { %v36_v16 = vmul.f32 %v75_v6, %v35_v12 }
  0x27   :  { %v45_v18 = vmul.f32 %v77_v7, %v44_v14 }
  0x2e   :  { %v79_v17 = vpop.eup %78 }
  0x2f   :  { %v81_v19 = vpop.eup %80  ;;  %v33_v20 = vmul.f32 0.6931472, %v79_v17 }
  0x30   :  { %v42_v21 = vmul.f32 0.6931472, %v81_v19 }
  0x31   :  { %v39_v22 = vsel %vm38_vm0, %v36_v16, %v33_v20 }
  0x32   :  { %v49_v23 = vsel %vm23_vm1, %v21_v0, %v39_v22  ;;  %v48_v24 = vsel %vm47_vm2, %v45_v18, %v42_v21 }
  0x33   :  { %v70_v25 = vadd.f32 -0.6931472, %v49_v23  ;;  %v50_v26 = vsel %vm24_vm3, %v22_v1, %v48_v24 }
  0x34   :  { %v71_v27 = vadd.f32 -0.6931472, %v50_v26 }
  0x35   :  { %53 = vst [vmem:[#allocation5] sm:$0xff] %v70_v25 }
  0x36   :  { %54 = vst [vmem:[#allocation5 + $0x8] sm:$0xff] %v71_v27 }
  0x37   :  { %115 = shalt.err (!%p112_p12)
}
  0x38   :  { %s116_s22 = scalar_lea.hbm %s167_s1, 256 }
  0x39   :  { %p117_p13 = scmp.ne.s32.totalorder %s167_s1, %s116_s22  ;;  %p120_p0 = scmp.lt.u32.totalorder %s116_s22, %s167_s1 }
  0x3b   :  { %p122_p1 = pnand %p120_p0, %p117_p13 }
  0x3d   :  { %125 = shalt.err (!%p122_p1)
}
  0x3e   :  { %64 = dma.vmem_to_hbm [thread:$0]  %s62_s18, 256, %s167_s1, [#allocation4]  }
  0x3f   :  { %128 = dma.done.wait [#allocation4], 256  }
  0x40   :  { %129 = vsyncadd [#allocation4], 4294967040 }
  0x41   :  { %68 = vsyncpa [#allocation3], 1 }
  0x42   :  { %69 = vsyncpa [#allocation4], 1 }

</bundles_post_ra>
